<compile_context>
chip_gen: v7x
topology: tpu7x:2x2x1
jax: 0.10.0
libtpu: 0.0.40
codegen_flags: <defaults>
</compile_context>

<pallas_src>
import math

import jax
import jax.numpy as jnp
from jax.experimental import pallas as pl
from jax.experimental.pallas import tpu as pltpu


def _round_up(n, m):
    return ((n + m - 1) // m) * m


def _periodic_embeddings_kernel(x_ref, wp_ref, wc_ref, ws_ref, b_ref, out_ref):
    # x_ref  : (TB, S)       batch tile of inputs
    # wp_ref : (S, S*K)      block-diagonal periodic frequencies (2*pi folded in)
    # wc_ref : (S*K, S*D)    block-diagonal cos half of the per-species linear weight
    # ws_ref : (S*K, S*D)    block-diagonal sin half of the per-species linear weight
    # b_ref  : (1, S*D)      flat per-species bias
    # out_ref: (TB, S*D)     lane-dense flat output (wrapper reshapes to (.., S, D))
    v = jnp.dot(x_ref[...], wp_ref[...],
                preferred_element_type=jnp.float32)            # (TB, S*K)
    y = (jnp.dot(jnp.cos(v), wc_ref[...], preferred_element_type=jnp.float32)
         + jnp.dot(jnp.sin(v), ws_ref[...], preferred_element_type=jnp.float32)
         + b_ref[...])                                         # (TB, S*D)
    out_ref[...] = jnp.maximum(y, 0.0)                         # one full-width store


def periodic_embeddings_forward(x, w_periodic, w_linear, b_linear,
                                *, block_rows=None,
                                vmem_budget_bytes=16 * 1024 * 1024):
    """Fused PeriodicEmbeddings forward.

    x:          (..., n_species)              float32
    w_periodic: (n_species, k)                float32
    w_linear:   (n_species, 2*k, d_embedding) float32
    b_linear:   (n_species, d_embedding)      float32
    returns     (..., n_species, d_embedding) float32
    """
    if x.ndim < 2:
        raise ValueError(f"The input must have at least two dimensions, got ndim={x.ndim}")
    *lead, S = x.shape
    Sp, K = w_periodic.shape
    Sl, K2, D = w_linear.shape
    assert S == Sp == Sl, "n_species mismatch"
    assert K2 == 2 * K, "linear in_features must be 2*k"
    assert b_linear.shape == (S, D)

    x2 = x.reshape(-1, S).astype(jnp.float32)
    B = x2.shape[0]
    b8 = _round_up(B, 8)

    # ---- batch tile selection (VMEM-budgeted, safe on v5e/v6e/v7x) ----
    if block_rows is None:
        # dominant per-row f32 bytes: double-buffered x & out tiles plus the
        # live lane-dense intermediates (v, cos, sin, y) inside the kernel.
        per_row = 4 * (2 * (S + S * D) + (3 * S * K + 2 * S * D))
        tb = max(8, min(4096, vmem_budget_bytes // max(per_row, 1)))
        tb = (tb // 8) * 8
    else:
        tb = max(8, (block_rows // 8) * 8)
    # v7x megacore: guarantee >= 2 grid steps whenever the batch allows it so
    # the "parallel" axis can shard across both TensorCores.
    if b8 >= 16:
        tb = min(tb, max(8, ((b8 // 2) // 8) * 8))
    # Never use a tile bigger than the (8-padded) batch itself.
    tb = min(tb, b8)

    b_pad = _round_up(B, tb)
    if b_pad != B:
        x2 = jnp.pad(x2, ((0, b_pad - B), (0, 0)))
    grid = (b_pad // tb,)

    # ---- weight prep (done once, outside the kernel) ----
    eye_s = jnp.eye(S, dtype=jnp.float32)
    wp = (2.0 * math.pi) * w_periodic.astype(jnp.float32)          # (S, K)
    # Block-diagonal frequency matrix: v = x @ wp_bd gives species s's K
    # frequencies in lanes [s*K, (s+1)*K).
    wp_bd = jnp.einsum("st,sk->stk", eye_s, wp).reshape(S, S * K)  # (S, S*K)
    w_l = w_linear.astype(jnp.float32)
    wc = w_l[:, :K, :]                                             # (S, K, D) cos half
    ws = w_l[:, K:, :]                                             # (S, K, D) sin half
    wc_bd = jnp.einsum("st,skd->sktd", eye_s, wc).reshape(S * K, S * D)
    ws_bd = jnp.einsum("st,skd->sktd", eye_s, ws).reshape(S * K, S * D)
    b_flat = b_linear.astype(jnp.float32).reshape(1, S * D)

    cost = pl.CostEstimate(
        flops=2 * b_pad * (S * (S * K) + 2 * (S * K) * (S * D) + S * D),
        transcendentals=2 * b_pad * S * K,
        bytes_accessed=4 * (b_pad * S + b_pad * S * D
                            + S * S * K + 2 * S * K * S * D + S * D),
    )

    out_flat = pl.pallas_call(
        _periodic_embeddings_kernel,
        out_shape=jax.ShapeDtypeStruct((b_pad, S * D), jnp.float32),
        grid_spec=pltpu.PrefetchScalarGridSpec(
            num_scalar_prefetch=0,
            grid=grid,
            in_specs=[
                pl.BlockSpec((tb, S), lambda i: (i, 0)),
                pl.BlockSpec((S, S * K), lambda i: (0, 0)),
                pl.BlockSpec((S * K, S * D), lambda i: (0, 0)),
                pl.BlockSpec((S * K, S * D), lambda i: (0, 0)),
                pl.BlockSpec((1, S * D), lambda i: (0, 0)),
            ],
            out_specs=pl.BlockSpec((tb, S * D), lambda i: (i, 0)),
        ),
        compiler_params=pltpu.CompilerParams(
            dimension_semantics=("parallel",),
            vmem_limit_bytes=32 * 1024 * 1024,
        ),
        cost_estimate=cost,
    )(x2, wp_bd, wc_bd, ws_bd, b_flat)

    # Trailing dims are contiguous, so this slice/reshape is free.
    return out_flat[:B].reshape(*lead, S, D)


def _reference(x, w_periodic, w_linear, b_linear):
    """Pure-JAX reference matching the PyTorch module."""
    v = 2.0 * math.pi * w_periodic * x[..., None]                   # (B, S, K)
    p = jnp.concatenate([jnp.cos(v), jnp.sin(v)], axis=-1)          # (B, S, 2K)
    y = jnp.einsum("bsf,sfd->bsd", p, w_linear,
                   precision=jax.lax.Precision.HIGHEST) + b_linear  # (B, S, D)
    return jnp.maximum(y, 0.0)


if __name__ == "__main__":
    key = jax.random.PRNGKey(0)
    k_wp, k_wl, k_bl, k_x = jax.random.split(key, 4)

    # Small shapes consistent with the module defaults.
    n_species = 4
    n_frequencies = 48     # k
    d_embedding = 24
    sigma = 0.01
    batch = 32

    # _Periodic init: trunc_normal(std=sigma, a=-3*sigma, b=3*sigma)
    w_periodic = sigma * jax.random.truncated_normal(
        k_wp, lower=-3.0, upper=3.0,
        shape=(n_species, n_frequencies), dtype=jnp.float32)
    # _NLinear init: uniform(+-d_in**-0.5), d_in = 2*k
    bound = (2 * n_frequencies) ** -0.5
    w_linear = jax.random.uniform(
        k_wl, (n_species, 2 * n_frequencies, d_embedding),
        minval=-bound, maxval=bound, dtype=jnp.float32)
    b_linear = jax.random.uniform(
        k_bl, (n_species, d_embedding),
        minval=-bound, maxval=bound, dtype=jnp.float32)

    x = jax.random.normal(k_x, (batch, n_species), dtype=jnp.float32)

    out = periodic_embeddings_forward(x, w_periodic, w_linear, b_linear)
    out = jax.block_until_ready(out)

    ref = _reference(x, w_periodic, w_linear, b_linear)
    assert out.shape == (batch, n_species, d_embedding)
    # Small tolerance: MXU f32 matmul pass decomposition / EUP cos-sin may
    # differ from the XLA reference by a few ULPs.
    max_err = float(jnp.max(jnp.abs(out - ref)))
    assert jnp.allclose(out, ref, atol=1e-3, rtol=1e-3), max_err

    print("KERNEL_OK")
</pallas_src>

<mosaic_0001>
module attributes {stable_mosaic.version = 11 : i64} {
  func.func @_periodic_embeddings_kernel(%arg0: i32, %arg1: memref<16x4xf32, #tpu.memory_space<vmem>>, %arg2: memref<4x192xf32, #tpu.memory_space<vmem>>, %arg3: memref<192x96xf32, #tpu.memory_space<vmem>>, %arg4: memref<192x96xf32, #tpu.memory_space<vmem>>, %arg5: memref<1x96xf32, #tpu.memory_space<vmem>>, %arg6: memref<16x96xf32, #tpu.memory_space<vmem>>) attributes {dimension_semantics = [#tpu.dimension_semantics<parallel>], iteration_bounds = array<i64: 2>, scalar_prefetch = 0 : i64, scratch_operands = 0 : i64, tpu.core_type = #tpu.core_type<tc>, window_params = [{transform_indices = @transform_0, window_bounds = array<i64: 16, 4>}, {pipeline_mode = #tpu.pipeline_mode<synchronous>, transform_indices = @transform_1, window_bounds = array<i64: 4, 192>}, {pipeline_mode = #tpu.pipeline_mode<synchronous>, transform_indices = @transform_2, window_bounds = array<i64: 192, 96>}, {pipeline_mode = #tpu.pipeline_mode<synchronous>, transform_indices = @transform_3, window_bounds = array<i64: 192, 96>}, {pipeline_mode = #tpu.pipeline_mode<synchronous>, transform_indices = @transform_4, window_bounds = array<i64: 1, 96>}, {transform_indices = @transform_5, window_bounds = array<i64: 16, 96>}]} {
    %c0 = arith.constant 0 : index
    %c0_0 = arith.constant 0 : index
    %0 = vector.load %arg1[%c0, %c0_0] : memref<16x4xf32, #tpu.memory_space<vmem>>, vector<16x4xf32>
    %c0_1 = arith.constant 0 : index
    %c0_2 = arith.constant 0 : index
    %1 = vector.load %arg2[%c0_1, %c0_2] : memref<4x192xf32, #tpu.memory_space<vmem>>, vector<4x192xf32>
    %cst = arith.constant dense<0.000000e+00> : vector<16x192xf32>
    %2 = tpu.matmul %0, %1, %cst {dimension_numbers = #tpu.dot_dimension_numbers<[1], [0], [0], [1], [0, 0, 1, 1], [], []>} : vector<16x4xf32>, vector<4x192xf32>, vector<16x192xf32> -> vector<16x192xf32>
    %3 = math.cos %2 : vector<16x192xf32>
    %c0_3 = arith.constant 0 : index
    %c0_4 = arith.constant 0 : index
    %4 = vector.load %arg3[%c0_3, %c0_4] : memref<192x96xf32, #tpu.memory_space<vmem>>, vector<192x96xf32>
    %cst_5 = arith.constant dense<0.000000e+00> : vector<16x96xf32>
    %5 = tpu.matmul %3, %4, %cst_5 {dimension_numbers = #tpu.dot_dimension_numbers<[1], [0], [0], [1], [0, 0, 1, 1], [], []>} : vector<16x192xf32>, vector<192x96xf32>, vector<16x96xf32> -> vector<16x96xf32>
    %6 = math.sin %2 : vector<16x192xf32>
    %c0_6 = arith.constant 0 : index
    %c0_7 = arith.constant 0 : index
    %7 = vector.load %arg4[%c0_6, %c0_7] : memref<192x96xf32, #tpu.memory_space<vmem>>, vector<192x96xf32>
    %cst_8 = arith.constant dense<0.000000e+00> : vector<16x96xf32>
    %8 = tpu.matmul %6, %7, %cst_8 {dimension_numbers = #tpu.dot_dimension_numbers<[1], [0], [0], [1], [0, 0, 1, 1], [], []>} : vector<16x192xf32>, vector<192x96xf32>, vector<16x96xf32> -> vector<16x96xf32>
    %9 = arith.addf %5, %8 : vector<16x96xf32>
    %c0_9 = arith.constant 0 : index
    %c0_10 = arith.constant 0 : index
    %10 = vector.load %arg5[%c0_9, %c0_10] : memref<1x96xf32, #tpu.memory_space<vmem>>, vector<1x96xf32>
    %11 = vector.broadcast %10 : vector<1x96xf32> to vector<16x96xf32>
    %12 = arith.addf %9, %11 : vector<16x96xf32>
    %cst_11 = arith.constant 0.000000e+00 : f32
    %13 = vector.broadcast %cst_11 : f32 to vector<16x96xf32>
    %14 = arith.maximumf %12, %13 : vector<16x96xf32>
    %c0_12 = arith.constant 0 : index
    %c0_13 = arith.constant 0 : index
    %15 = vector.load %arg6[%c0_12, %c0_13] : memref<16x96xf32, #tpu.memory_space<vmem>>, vector<16x96xf32>
    tpu.vector_store %arg6[%c0_12, %c0_13], %14 {strides = array<i32>} : memref<16x96xf32, #tpu.memory_space<vmem>>, vector<16x96xf32>,
    return
  }
  func.func @transform_0(%arg0: i32) -> (i32, i32) {
    %c0_i32 = arith.constant 0 : i32
    %c0_i32_0 = arith.constant 0 : i32
    return %arg0, %c0_i32 : i32, i32
  }
  func.func @transform_1(%arg0: i32) -> (i32, i32) {
    %c0_i32 = arith.constant 0 : i32
    %c0_i32_0 = arith.constant 0 : i32
    %c0_i32_1 = arith.constant 0 : i32
    return %c0_i32, %c0_i32_0 : i32, i32
  }
  func.func @transform_2(%arg0: i32) -> (i32, i32) {
    %c0_i32 = arith.constant 0 : i32
    %c0_i32_0 = arith.constant 0 : i32
    %c0_i32_1 = arith.constant 0 : i32
    return %c0_i32, %c0_i32_0 : i32, i32
  }
  func.func @transform_3(%arg0: i32) -> (i32, i32) {
    %c0_i32 = arith.constant 0 : i32
    %c0_i32_0 = arith.constant 0 : i32
    %c0_i32_1 = arith.constant 0 : i32
    return %c0_i32, %c0_i32_0 : i32, i32
  }
  func.func @transform_4(%arg0: i32) -> (i32, i32) {
    %c0_i32 = arith.constant 0 : i32
    %c0_i32_0 = arith.constant 0 : i32
    %c0_i32_1 = arith.constant 0 : i32
    return %c0_i32, %c0_i32_0 : i32, i32
  }
  func.func @transform_5(%arg0: i32) -> (i32, i32) {
    %c0_i32 = arith.constant 0 : i32
    %c0_i32_0 = arith.constant 0 : i32
    return %arg0, %c0_i32 : i32, i32
  }
}

</mosaic_0001>

<bundles_post_ra>
// kernel: tpu_custom_call.1
= control target key start
LH: loop header
LB: loop body
LE: loop exit
PB: predicated region body
PF: predicated region fallthrough
CT: control target
= control target key end

     0   :  { %10 = vsyncpa [#allocation3], 0  ;;  %s2431_s0 = inlined_call_operand.vmem [shape: f32[32,4], index: 0, kind: input, shape index: {}]   ;;  %s2432_s1 = inlined_call_operand.vmem [shape: f32[4,192], index: 1, kind: input, shape index: {}]   ;;  %s2433_s2 = inlined_call_operand.hbm [shape: f32[192,96], index: 2, kind: input, shape index: {}]   ;;  %s2434_s3 = inlined_call_operand.hbm [shape: f32[192,96], index: 3, kind: input, shape index: {}]   ;;  %s2435_s4 = inlined_call_operand.vmem [shape: f32[1,96], index: 4, kind: input, shape index: {}]   ;;  %s2436_s5 = inlined_call_operand.hbm [shape: f32[32,96], index: 5, kind: output, shape index: {}]  }
   0x1   :  { %11 = vsyncpa [#allocation6], 0 }
   0x2   :  { %12 = vsyncpa [#allocation4], 0 }
   0x3   :  { %14 = vsyncpa [#allocation4 + $0x1], 0  ;;  %s1909_s18 = smov 0   ;;  %s1911_s19 = smov 0  }
   0x4   :  { %s1913_s20 = smov 0   ;;  %s1915_s21 = smov 0  }
   0x5 LB: > { %s1930_s22 = sadd.s32 4294967295, %s1862_s21   ;;  %s1501_s23 = sadd.s32 4294967294, %s1862_s21   ;;  %s1862_s21 = sphi %s1915_s21, %s2460_s21   ;;  %s1858_s20 = sphi %s1913_s20, %s2459_s20   ;;  %s1854_s19 = sphi %s1911_s19, %s2458_s19   ;;  %s1850_s18 = sphi %s1909_s18, %s2457_s18  }
   0x6   : > { %s1934_s24 = sadd.s32 1, %s1862_s21   ;;  %s137_s25 = sadd.s32 1, %s1858_s20 }
   0x7   : > { %s134_s26 = ssub.s32 %s1862_s21, %s1934_s24  ;;  %p147_p0 = scmp.ne.s32.totalorder %s1858_s20, %s1854_s19 }
   0x8   : > { %p135_p1 = scmp.eq.s32.totalorder %s134_s26, 0  ;;  %p148_p2 = scmp.eq.s32.totalorder %s1930_s22, 1 }
   0x9   : > { %p153_p3 = scmp.ne.s32.totalorder %s1854_s19, %s1850_s18  ;;  %p154_p4 = scmp.eq.s32.totalorder %s1501_s23, 1 }
   0xa   : > { %s1945_s27 = scalar_select %p135_p1, %s1858_s20, %s137_s25  }
   0xb   : > { %p1947_p5 = por %p148_p2, %p147_p0  ;;  %p1951_p6 = por %p154_p4, %p153_p3 }
   0xc   : > { %p1502_p7 = scmp.ge.s32.totalorder %s1862_s21, 1  ;;  %p161_p8 = scmp.lt.s32.totalorder %s1862_s21, 3 }
   0xd   : > { %s2440_s28 = scalar_select %p1947_p5, 1, 0 }
   0xe   : > { %s2441_s29 = scalar_select %p1951_p6, 1, 0 }
   0xf   : > { %p2437_p9 = scmp.eq.s32.totalorder %s1930_s22, 0  ;;  %p1958_p10 = pnand %p1502_p7, %p161_p8 }
  0x10   : > { %s1864_s6 = smov [#allocation2]   ;;  %s1865_s9 = smov [#allocation5]  }
  0x11   : > { %s2442_s30 = scalar_select %p1958_p10, 1, 0 }
  0x12   : > { %s176_s7 = sshll.u32 %s1864_s6, 4  ;;  %p1657_p11 = pneg %p1958_p10  ;;  %s177_s7 = int_to_ptr.vmem [resolvable:$true] %s176_s7 }
  0x13   : > { %s189_s10 = sshll.u32 %s1865_s9, 4  ;;  %s1736_s13 = scalar_lea.hbm %s2433_s2, 3072  ;;  %s1970_s10 = int_to_ptr.vmem [resolvable:$true] %s189_s10 }
  0x14   : > { %p1966_p12 = pnand %p2437_p9, %p1657_p11  ;;  %p1737_p13 = scmp.ne.s32.totalorder %s2433_s2, %s1736_s13 }
  0x15   : > { %p1743_p3 = scmp.lt.u32.totalorder %s1736_s13, %s2433_s2 }
  0x16   : > { %p1738_p0 = pneg %p1966_p12 }
  0x18   : > { %p1739_p1 = pnand %p1738_p0, %p1737_p13 }
  0x1a   : > { %p1740_p2 = pneg %p1739_p1 }
  0x1c   : > { %p1745_p4 = pnand %p1743_p3, %p1740_p2 }
  0x1e   : > { %1748 = shalt.err (!%p1745_p4)
}
  0x1f   : > { %s1749_s23 = scalar_lea.vmem %s177_s7, 3072  ;;  %p1757_p9 = scmp.lt.s32.totalorder %s177_s7, %s177_s7 }
  0x20   : > { %p1750_p7 = scmp.ne.s32.totalorder %s177_s7, %s1749_s23  ;;  %p1758_p6 = scmp.lt.s32.totalorder %s1749_s23, %s1749_s23 }
  0x22   : > { %p1752_p8 = pnand %p1750_p7, %p1738_p0  ;;  %p1759_p5 = por %p1758_p6, %p1757_p9 }
  0x24   : > { %p1753_p11 = pneg %p1752_p8 }
  0x26   : > { %p1760_p10 = pnand %p1759_p5, %p1753_p11 }
  0x28   : > { %1763 = shalt.err (!%p1760_p10)
}
  0x29   : > { %s1866_s25 = smov 128   ;;  %s1867_s26 = smov 8  }
  0x2a   : > { %1660 = dma.hbm_to_vmem [thread:$0]  (!%p1966_p12), %s2433_s2, 3072, %s177_s7, [#allocation3], %s1866_s25, %s1866_s25, %s1867_s26  }
  0x2b   : > { %s1764_s13 = scalar_lea.hbm %s2434_s3, 3072 }
  0x2c   : > { %p1765_p13 = scmp.ne.s32.totalorder %s2434_s3, %s1764_s13  ;;  %p1771_p9 = scmp.lt.u32.totalorder %s1764_s13, %s2434_s3 }
  0x2e   : > { %p1767_p5 = pnand %p1765_p13, %p1738_p0 }
  0x30   : > { %p1768_p6 = pneg %p1767_p5 }
  0x32   : > { %p1773_p10 = pnand %p1771_p9, %p1768_p6 }
  0x34   : > { %1776 = shalt.err (!%p1773_p10)
}
  0x35   : > { %s1777_s7 = scalar_lea.vmem %s1970_s10, 3072  ;;  %p1785_p4 = scmp.lt.s32.totalorder %s1970_s10, %s1970_s10 }
  0x36   : > { %p1778_p1 = scmp.ne.s32.totalorder %s1970_s10, %s1777_s7  ;;  %p1786_p7 = scmp.lt.s32.totalorder %s1777_s7, %s1777_s7 }
  0x38   : > { %p1780_p2 = pnand %p1778_p1, %p1738_p0  ;;  %p1787_p8 = por %p1786_p7, %p1785_p4 }
  0x3a   : > { %p1781_p3 = pneg %p1780_p2 }
  0x3c   : > { %p1788_p11 = pnand %p1787_p8, %p1781_p3 }
  0x3e   : > { %1791 = shalt.err (!%p1788_p11)
}
  0x3f   : > { %1663 = dma.hbm_to_vmem [thread:$0]  (!%p1966_p12), %s2434_s3, 3072, %s1970_s10, [#allocation6], %s1866_s25, %s1866_s25, %s1867_s26  }
  0x40   : > { %p2444_p13 = scmp.ne.s32.totalorder %s2442_s30, 0 }
  0x41   : > { %p2445_p5 = scmp.eq.s32.totalorder (!%p2444_p13), %s1930_s22, 0 }
  0x42   : > { %217 = sbr.rel (%p2444_p13) target bundleno = 662 (0x296), region = 40 }
  0x49   : > { %1837 = dma.done.wait (%p2445_p5), [#allocation3], 3072   ;;  %p2446_p0 = pmov %p2445_p5 }
  0x4b   : > { %1839 = vsyncadd (%p2446_p0), [#allocation3], 4294964224  ;;  %p2447_p6 = pmov %p2446_p0 }
  0x4c   : > { %p2448_p9 = pmov %p2446_p0 }
  0x4d   : > { %1841 = dma.done.wait (%p2447_p6), [#allocation6], 3072  }
  0x4e   : > { %1843 = vsyncadd (%p2448_p9), [#allocation6], 4294964224  ;;  %s1510_s8 = sshll.u32 %s1930_s22, 1  ;;  %v1868_v0 = vmov 0.0   ;;  %v258_v1 = vld [vmem:[%s2432_s1] sm:$0xff]  ;;  %vm268_vm0 = vcmask 1043456  }
  0x4f   : > { %337 = vmatprep.mubr.f32.mxu0 %v1868_v0  ;;  %p250_p12 = scmp.lt.s32.totalorder %s1510_s8, 3  ;;  %v260_v2 = vcombine.high %v258_v1, %v258_v1  ;;  %vm261_vm1 = vcmask 31744   ;;  %v1202_v5 = vld [vmem:[#allocation5] sm:$0xff]  ;;  %v1203_v6 = vld [vmem:[#allocation5 + $0x8] sm:$0xff]  ;;  %v1869_v10 = vmov 0.0|0.0   ;;  %v1204_v12 = vld [vmem:[#allocation5 + $0x10] sm:$0xff] }
  0x50   : > { %v762_v7 = vld [vmem:[#allocation2] sm:$0xff]  ;;  %v1560_v8 = vpack.c.bf16 %v1203_v6, %v1202_v5  ;;  %v763_v9 = vld [vmem:[#allocation2 + $0x8] sm:$0xff]  ;;  %1559 = vmatprep.subr.bf16.mxu1 %v1869_v10  ;;  %v1205_v13 = vld [vmem:[#allocation5 + $0x18] sm:$0xff]  ;;  %s246_s12 = sand.u32 1, %s1854_s19   ;;  %s1558_s17 = sshll.u32 %s1930_s22, 8 }
  0x51   : > { %s2462_s8 = smov (!%p250_p12, %s1510_s8), 3  ;;  %1512 = vmatprep.subr.msk.mxu0 %vm268_vm0, %v260_v2  ;;  %v1596_v11 = vpack.c.bf16 %v763_v9, %v762_v7  ;;  %v764_v14 = vld [vmem:[#allocation2 + $0x10] sm:$0xff]  ;;  %v1563_v15 = vpack.c.bf16 %v1205_v13, %v1204_v12  ;;  %v765_v16 = vld [vmem:[#allocation2 + $0x18] sm:$0xff]  ;;  %v1206_v18 = vld [vmem:[#allocation5 + $0x20] sm:$0xff]  ;;  %s1509_s15 = sshll.u32 %s246_s12, 4 }
  0x52   : > { %s1511_s30 = sshll.u32 %s2462_s8, 3  ;;  %1513 = vmatpush1.msk.msra.mxu0 %vm268_vm0, %v258_v1  ;;  %1561 = vmatpush1.bf16.msra.mxu1 %v1560_v8  ;;  %v1599_v17 = vpack.c.bf16 %v765_v16, %v764_v14  ;;  %v1207_v19 = vld [vmem:[#allocation5 + $0x28] sm:$0xff]  ;;  %v766_v20 = vld [vmem:[#allocation2 + $0x20] sm:$0xff]  ;;  %v1208_v24 = vld [vmem:[#allocation5 + $0x30] sm:$0xff]  ;;  %s248_s16 = scalar_lea.vmem [#allocation7], %s1509_s15 }
  0x53   : > { %s253_s26 = scalar_lea.vmem %s2431_s0, %s1511_s30  ;;  %1595 = vmatprep.subr.bf16.mxu0 %v1869_v10  ;;  %1562 = vmatprep.subr.bf16.mxu1 %v1869_v10  ;;  %v1566_v21 = vpack.c.bf16 %v1207_v19, %v1206_v18  ;;  %v767_v22 = vld [vmem:[#allocation2 + $0x28] sm:$0xff]  ;;  %v1209_v25 = vld [vmem:[#allocation5 + $0x38] sm:$0xff]  ;;  %v768_v26 = vld [vmem:[#allocation2 + $0x30] sm:$0xff]  ;;  %s1417_s7 = sshll.u32 %s248_s16, 4  ;;  %s2388_s7 = int_to_ptr.vmem [resolvable:$true] %s1417_s7 }
  0x54   : > { %v256_v3 = vld [vmem:[%s253_s26] sm:$0xff]  ;;  %v257_v4 = vld [vmem:[%s253_s26 + $0x8] sm:$0xff]  ;;  %v1602_v23 = vpack.c.bf16 %v767_v22, %v766_v20  ;;  %v1569_v27 = vpack.c.bf16 %v1209_v25, %v1208_v24  ;;  %v769_v28 = vld [vmem:[#allocation2 + $0x38] sm:$0xff]  ;;  %s2386_s8 = scalar_lea.hbm %s2436_s5, %s1558_s17  ;;  %s2390_s30 = scalar_lea.sflag [#allocation4], %s246_s12 }
  0x55   : > { %1514 = vmatmul.mubr.msk.f32.vlgmr.msra.gmra.mrb[0].mxu0 %vm261_vm1, %v256_v3  ;;  %v1605_v29 = vpack.c.bf16 %v769_v28, %v768_v26  ;;  %v1210_v30 = vld [vmem:[#allocation5 + $0x40] sm:$0xff]  ;;  %v1211_v31 = vld [vmem:[#allocation5 + $0x48] sm:$0xff]  ;;  %v1212_v36 = vld [vmem:[#allocation5 + $0x50] sm:$0xff]  ;;  %s1792_s10 = scalar_lea.vmem %s2388_s7, 256  ;;  %p2455_p1 = scmp.ne.s32.totalorder %s2440_s28, 0 }
  0x56   : > { %343 = vmatprep.mubr.f32.mxu0 %v1868_v0  ;;  %1597 = vmatpush1.bf16.msra.mxu0 %v1596_v11  ;;  %v770_v32 = vld [vmem:[#allocation2 + $0x40] sm:$0xff]  ;;  %v1572_v33 = vpack.c.bf16 %v1211_v31, %v1210_v30  ;;  %v771_v34 = vld [vmem:[#allocation2 + $0x48] sm:$0xff]  ;;  %v1213_v37 = vld [vmem:[#allocation5 + $0x58] sm:$0xff]  ;;  %p1793_p10 = scmp.ne.s32.totalorder %s2388_s7, %s1792_s10  ;;  %s1876_s22 = smov [#allocation7]  }
  0x57   : > { %1598 = vmatprep.subr.bf16.mxu0 %v1869_v10  ;;  %1564 = vmatpush1.bf16.msra.mxu1 %v1563_v15  ;;  %v1608_v35 = vpack.c.bf16 %v771_v34, %v770_v32  ;;  %v772_v38 = vld [vmem:[#allocation2 + $0x50] sm:$0xff]  ;;  %v1575_v39 = vpack.c.bf16 %v1213_v37, %v1212_v36  ;;  %v773_v40 = vld [vmem:[#allocation2 + $0x58] sm:$0xff]  ;;  %v1214_v42 = vld [vmem:[#allocation5 + $0x60] sm:$0xff]  ;;  %s1796_s25 = sshll.u32 %s1876_s22, 4  ;;  %s1797_s25 = int_to_ptr.vmem [resolvable:$false] %s1796_s25 }
  0x58   : > { %1565 = vmatprep.subr.bf16.mxu1 %v1869_v10  ;;  %v1611_v41 = vpack.c.bf16 %v773_v40, %v772_v38  ;;  %v1215_v43 = vld [vmem:[#allocation5 + $0x68] sm:$0xff]  ;;  %v774_v44 = vld [vmem:[#allocation2 + $0x60] sm:$0xff]  ;;  %v1216_v48 = vld [vmem:[#allocation5 + $0x70] sm:$0xff]  ;;  %p1794_p2 = pnand %p1793_p10, %p2455_p1  ;;  %s1798_s26 = scalar_lea.vmem %s1797_s25, 512 }
  0x59   : > { %1515 = vmatmul.mubr.msk.f32.gmra.mrb[2].mxu0 %vm261_vm1, %v257_v4  ;;  %v1578_v45 = vpack.c.bf16 %v1215_v43, %v1214_v42  ;;  %v775_v46 = vld [vmem:[#allocation2 + $0x68] sm:$0xff]  ;;  %v1217_v49 = vld [vmem:[#allocation5 + $0x78] sm:$0xff]  ;;  %v776_v50 = vld [vmem:[#allocation2 + $0x70] sm:$0xff]  ;;  %p1799_p4 = scmp.lt.s32.totalorder %s2388_s7, %s1797_s25  ;;  %p1800_p7 = scmp.lt.s32.totalorder %s1798_s26, %s1792_s10 }
  0x5a   : > { %1600 = vmatpush1.bf16.msra.mxu0 %v1599_v17  ;;  %v1614_v47 = vpack.c.bf16 %v775_v46, %v774_v44  ;;  %v1581_v51 = vpack.c.bf16 %v1217_v49, %v1216_v48  ;;  %v777_v52 = vld [vmem:[#allocation2 + $0x78] sm:$0xff]  ;;  %v1218_v54 = vld [vmem:[#allocation5 + $0x80] sm:$0xff]  ;;  %v1219_v55 = vld [vmem:[#allocation5 + $0x88] sm:$0xff]  ;;  %v1870_v48 = vmov 683565275   ;;  %p1795_p3 = pneg %p1794_p2 }
  0x5b   : > { %1601 = vmatprep.subr.bf16.mxu0 %v1869_v10  ;;  %1567 = vmatpush1.bf16.msra.mxu1 %v1566_v21  ;;  %v1617_v53 = vpack.c.bf16 %v777_v52, %v776_v50  ;;  %v778_v56 = vld [vmem:[#allocation2 + $0x80] sm:$0xff]  ;;  %v1584_v57 = vpack.c.bf16 %v1219_v55, %v1218_v54  ;;  %v779_v58 = vld [vmem:[#allocation2 + $0x88] sm:$0xff]  ;;  %v1220_v60 = vld [vmem:[#allocation5 + $0x90] sm:$0xff]  ;;  %v1871_v52 = vmov 2475754826   ;;  %p1801_p8 = por %p1800_p7, %p1799_p4 }
  0x5c   : > { %1568 = vmatprep.subr.bf16.mxu1 %v1869_v10  ;;  %v1620_v59 = vpack.c.bf16 %v779_v58, %v778_v56  ;;  %v1221_v61 = vld [vmem:[#allocation5 + $0x98] sm:$0xff]  ;;  %v780_v62 = vld [vmem:[#allocation2 + $0x90] sm:$0xff]  ;;  %v1222_v1 = vld [vmem:[#allocation5 + $0xa0] sm:$0xff]  ;;  %v1872_v54 = vmov 2131351028  }
  0x5d   : > { %v1587_v63 = vpack.c.bf16 %v1221_v61, %v1220_v60  ;;  %v781_v0 = vld [vmem:[#allocation2 + $0x98] sm:$0xff]  ;;  %v1223_v2 = vld [vmem:[#allocation5 + $0xa8] sm:$0xff]  ;;  %v782_v4 = vld [vmem:[#allocation2 + $0xa0] sm:$0xff]  ;;  %v1873_v56 = vmov 2102212464   ;;  %p1802_p11 = pnand %p1801_p8, %p1795_p3 }
  0x5e   : > { %1603 = vmatpush1.bf16.msra.mxu0 %v1602_v23  ;;  %v1623_v3 = vpack.c.bf16 %v781_v0, %v780_v62  ;;  %v783_v5 = vld [vmem:[#allocation2 + $0xa8] sm:$0xff]  ;;  %v1590_v6 = vpack.c.bf16 %v1223_v2, %v1222_v1  ;;  %v1224_v8 = vld [vmem:[#allocation5 + $0xb0] sm:$0xff]  ;;  %v1225_v9 = vld [vmem:[#allocation5 + $0xb8] sm:$0xff]  ;;  %v1874_v58 = vmov 920167782  }
  0x5f   : > { %1604 = vmatprep.subr.bf16.mxu0 %v1869_v10  ;;  %1570 = vmatpush1.bf16.msra.mxu1 %v1569_v27  ;;  %v1626_v7 = vpack.c.bf16 %v783_v5, %v782_v4  ;;  %v784_v11 = vld [vmem:[#allocation2 + $0xb0] sm:$0xff]  ;;  %v785_v12 = vld [vmem:[#allocation2 + $0xb8] sm:$0xff]  ;;  %v1593_v13 = vpack.c.bf16 %v1225_v9, %v1224_v8  ;;  %v1875_v1 = vmov 1326507024  }
  0x60   : > { %1571 = vmatprep.subr.bf16.mxu1 %v1869_v10  ;;  %v1629_v14 = vpack.c.bf16 %v785_v12, %v784_v11 }
  0x62   : > { %1606 = vmatpush1.bf16.msra.mxu0 %v1605_v29 }
  0x63   : > { %1607 = vmatprep.subr.bf16.mxu0 %v1869_v10  ;;  %1573 = vmatpush1.bf16.msra.mxu1 %v1572_v33 }
  0x64   : > { %1574 = vmatprep.subr.bf16.mxu1 %v1869_v10 }
  0x66   : > { %1609 = vmatpush1.bf16.msra.mxu0 %v1608_v35 }
  0x67   : > { %1610 = vmatprep.subr.bf16.mxu0 %v1869_v10  ;;  %1576 = vmatpush1.bf16.msra.mxu1 %v1575_v39 }
  0x68   : > { %1577 = vmatprep.subr.bf16.mxu1 %v1869_v10 }
  0x6a   : > { %1612 = vmatpush1.bf16.msra.mxu0 %v1611_v41 }
  0x6b   : > { %1613 = vmatprep.subr.bf16.mxu0 %v1869_v10  ;;  %1579 = vmatpush1.bf16.msra.mxu1 %v1578_v45 }
  0x6c   : > { %1580 = vmatprep.subr.bf16.mxu1 %v1869_v10 }
  0x6e   : > { %1615 = vmatpush1.bf16.msra.mxu0 %v1614_v47 }
  0x6f   : > { %1616 = vmatprep.subr.bf16.mxu0 %v1869_v10  ;;  %1582 = vmatpush1.bf16.msra.mxu1 %v1581_v51 }
  0x70   : > { %1583 = vmatprep.subr.bf16.mxu1 %v1869_v10 }
  0x72   : > { %1618 = vmatpush1.bf16.msra.mxu0 %v1617_v53 }
  0x73   : > { %1619 = vmatprep.subr.bf16.mxu0 %v1869_v10  ;;  %1585 = vmatpush1.bf16.msra.mxu1 %v1584_v57 }
  0x74   : > { %1586 = vmatprep.subr.bf16.mxu1 %v1869_v10 }
  0x76   : > { %1621 = vmatpush1.bf16.msra.mxu0 %v1620_v59 }
  0x77   : > { %1622 = vmatprep.subr.bf16.mxu0 %v1869_v10  ;;  %1588 = vmatpush1.bf16.msra.mxu1 %v1587_v63 }
  0x78   : > { %1589 = vmatprep.subr.bf16.mxu1 %v1869_v10 }
  0x7a   : > { %1624 = vmatpush1.bf16.msra.mxu0 %v1623_v3 }
  0x7b   : > { %1625 = vmatprep.subr.bf16.mxu0 %v1869_v10  ;;  %1591 = vmatpush1.bf16.msra.mxu1 %v1590_v6 }
  0x7c   : > { %1592 = vmatprep.subr.bf16.mxu1 %v1869_v10 }
  0x7e   : > { %1627 = vmatpush1.bf16.msra.mxu0 %v1626_v7 }
  0x7f   : > { %1628 = vmatprep.subr.bf16.mxu0 %v1869_v10  ;;  %1594 = vmatpush1.bf16.msra.mxu1 %v1593_v13 }
  0x82   : > { %1630 = vmatpush1.bf16.msra.mxu0 %v1629_v14 }
 0x128   : > { %v2059_v15 = vpop.f32.mrb[0].mxu0 }
 0x129   : > { %v350_v16 = vand.u32 2147483647, %v2059_v15  ;;  %v353_v17 = vand.u32 2139095040, %v2059_v15  ;;  %v2064_v18 = vpop.f32.mrb[1].mxu0 }
 0x12a   : > { %v453_v19 = vand.u32 2147483647, %v2064_v18  ;;  %v456_v20 = vand.u32 2139095040, %v2064_v18 }
 0x12b   : > { %v354_v21 = vshrl.u32 %v353_v17, 23  ;;  %v357_v22 = vand.u32 8388607, %v350_v16 }
 0x12c   : > { %v457_v23 = vshrl.u32 %v456_v20, 23  ;;  %v460_v10 = vand.u32 8388607, %v453_v19  ;;  %v2072_v24 = vpop.f32.mrb[2].mxu0 }
 0x12d   : > { %v1516_v25 = vadd.s32 4294967169, %v354_v21  ;;  %v556_v26 = vand.u32 2147483647, %v2072_v24  ;;  %v2075_v27 = vpop.f32.mrb[3].mxu0  ;;  %v559_v29 = vand.u32 2139095040, %v2072_v24  ;;  %v358_v30 = vor.u32 8388608, %v357_v22 }
 0x12e   : > { %v1520_v28 = vadd.s32 4294967169, %v457_v23  ;;  %v461_v32 = vor.u32 8388608, %v460_v10  ;;  %v659_v38 = vand.u32 2147483647, %v2075_v27  ;;  %v662_v46 = vand.u32 2139095040, %v2075_v27 }
 0x12f   : > { %v360_v31 = vadd.s32 1, %v1516_v25  ;;  %v560_v34 = vshrl.u32 %v559_v29, 23  ;;  %v2080_v35 = vand.u32 8388607, %v556_v26  ;;  %v2083_v41 = vshll.u32 %v358_v30, 8 }
 0x130   : > { %v463_v33 = vadd.s32 1, %v1520_v28  ;;  %v2087_v44 = vshll.u32 %v461_v32, 8 }
 0x131   : > { %vm361_vm2 = vcmp.gt.s32.totalorder %v360_v31, 0  ;;  %v1524_v37 = vadd.s32 4294967169, %v560_v34  ;;  %v564_v45 = vor.u32 8388608, %v2080_v35 }
 0x132   : > { %v362_v36 = vsel %vm361_vm2, %v360_v31, 0  ;;  %vm464_vm3 = vcmp.gt.s32.totalorder %v463_v33, 0 }
 0x133   : > { %v363_v39 = vshrl.u32 %v362_v36, 5  ;;  %v364_v40 = vand.u32 31, %v362_v36  ;;  %v465_v42 = vsel %vm464_vm3, %v463_v33, 0  ;;  %v2092_v51 = vadd.s32 1, %v1524_v37 }
 0x134   : > { %v2085_v43 = vshrl.u32 %v465_v42, 5  ;;  %v467_v50 = vand.u32 31, %v465_v42 }
 0x135   : > { %v365_v47 = vsub.s32 32, %v364_v40  ;;  %v367_v49 = vshll.u32 %v1870_v48, %v364_v40  ;;  %v370_v53 = vshll.u32 %v1871_v52, %v364_v40  ;;  %v373_v55 = vshll.u32 %v1872_v54, %v364_v40 }
 0x136   : > { %v376_v57 = vshll.u32 %v1873_v56, %v364_v40  ;;  %v379_v59 = vshll.u32 %v1874_v58, %v364_v40  ;;  %vm382_vm4 = vcmp.lt.s32.totalorder %v363_v39, 1  ;;  %vm383_vm5 = vcmp.lt.s32.totalorder %v363_v39, 2 }
 0x137   : > { %v368_v60 = vshrl.u32 %v1871_v52, %v365_v47  ;;  %v371_v61 = vshrl.u32 %v1872_v54, %v365_v47  ;;  %v374_v62 = vshrl.u32 %v1873_v56, %v365_v47  ;;  %v366_v63 = vshrl.u32 %v1870_v48, %v365_v47 }
 0x138   : > { %v377_v0 = vshrl.u32 %v1874_v58, %v365_v47  ;;  %v380_v2 = vshrl.u32 %v1875_v1, %v365_v47  ;;  %v468_v6 = vsub.s32 32, %v467_v50  ;;  %vm384_vm6 = vcmp.lt.s32.totalorder %v363_v39, 3 }
 0x139   : > { %v369_v3 = vor.u32 %v368_v60, %v367_v49  ;;  %v372_v4 = vor.u32 %v371_v61, %v370_v53  ;;  %v375_v5 = vor.u32 %v374_v62, %v373_v55  ;;  %vm385_vm7 = vcmp.lt.s32.totalorder %v363_v39, 4 }
 0x13a   : > { %v378_v7 = vor.u32 %v377_v0, %v376_v57  ;;  %v381_v8 = vor.u32 %v380_v2, %v379_v59  ;;  %v470_v21 = vshll.u32 %v1870_v48, %v467_v50  ;;  %v471_v10 = vshrl.u32 %v1871_v52, %v468_v6 }
 0x13b   : > { %v386_v9 = vsel %vm382_vm4, %v366_v63, %v369_v3  ;;  %v387_v11 = vsel %vm385_vm7, %v375_v5, 2102212464  ;;  %v390_v12 = vsel %vm382_vm4, %v369_v3, %v372_v4  ;;  %v394_v13 = vsel %vm382_vm4, %v372_v4, %v375_v5 }
 0x13c   : > { %v388_v14 = vsel %vm384_vm6, %v372_v4, %v387_v11  ;;  %v391_v17 = vsel %vm385_vm7, %v378_v7, 920167782  ;;  %v395_v20 = vsel %vm385_vm7, %v381_v8, 1326507024  ;;  %v473_v25 = vshll.u32 %v1871_v52, %v467_v50 }
 0x13d   : > { %v392_v22 = vsel %vm384_vm6, %v375_v5, %v391_v17  ;;  %v396_v23 = vsel %vm384_vm6, %v378_v7, %v395_v20  ;;  %v389_v28 = vsel %vm383_vm5, %v386_v9, %v388_v14  ;;  %v474_v31 = vshrl.u32 %v1872_v54, %v468_v6 }
 0x13e   : > { %v393_v29 = vsel %vm383_vm5, %v390_v12, %v392_v22  ;;  %v397_v30 = vsel %vm383_vm5, %v394_v13, %v396_v23  ;;  %v472_v37 = vor.u32 %v471_v10, %v470_v21  ;;  %v476_v42 = vshll.u32 %v1872_v54, %v467_v50 }
 0x13f   : > { %v2115_v32 = vmul.u32.u64.low %v2083_v41, %v397_v30  ;;  %v2116_v33 = vmul.u32.u64.high %v2083_v41, %v397_v30, %v2115_v32  ;;  %v2119_v34 = vmul.u32.u64.low %v2083_v41, %v393_v29  ;;  %v2120_v36 = vmul.u32.u64.high %v2083_v41, %v393_v29, %v2119_v34 }
 0x140   : > { %v475_v40 = vor.u32 %v474_v31, %v473_v25  ;;  %v477_v47 = vshrl.u32 %v1873_v56, %v468_v6  ;;  %v469_v39 = vshrl.u32 %v1870_v48, %v468_v6  ;;  %v479_v49 = vshll.u32 %v1873_v56, %v467_v50 }
 0x141   : > { %v480_v53 = vshrl.u32 %v1874_v58, %v468_v6  ;;  %v483_v55 = vshrl.u32 %v1875_v1, %v468_v6  ;;  %v405_v57 = vmul.u32 %v2083_v41, %v389_v28  ;;  %v482_v60 = vshll.u32 %v1874_v58, %v467_v50 }
 0x142   : > { %v478_v59 = vor.u32 %v477_v47, %v476_v42  ;;  %vm485_vm8 = vcmp.lt.s32.totalorder %v2085_v43, 1  ;;  %vm407_vm9 = vc.u32 %v2116_v33, %v2119_v34  ;;  %v408_v61 = vadd.s32 1, %v2120_v36 }
 0x143   : > { %v481_v62 = vor.u32 %v480_v53, %v479_v49  ;;  %vm486_vm10 = vcmp.lt.s32.totalorder %v2085_v43, 2  ;;  %v484_v63 = vor.u32 %v483_v55, %v482_v60  ;;  %vm487_vm11 = vcmp.lt.s32.totalorder %v2085_v43, 3 }
 0x144   : > { %vm488_vm12 = vcmp.lt.s32.totalorder %v2085_v43, 4  ;;  %v493_v0 = vsel %vm485_vm8, %v472_v37, %v475_v40  ;;  %v409_v41 = vsel %vm407_vm9, %v408_v61, %v2120_v36  ;;  %v497_v3 = vsel %vm485_vm8, %v475_v40, %v478_v59 }
 0x145   : > { %v490_v2 = vsel %vm488_vm12, %v478_v59, 2102212464  ;;  %v494_v50 = vsel %vm488_vm12, %v481_v62, 920167782  ;;  %v410_v4 = vadd.s32 %v409_v41, %v405_v57  ;;  %v489_v5 = vsel %vm485_vm8, %v469_v39, %v472_v37 }
 0x146   : > { %v495_v6 = vsel %vm487_vm11, %v478_v59, %v494_v50  ;;  %v498_v7 = vsel %vm488_vm12, %v484_v63, 1326507024  ;;  %v491_v8 = vsel %vm487_vm11, %v475_v40, %v490_v2  ;;  %vm567_vm13 = vcmp.gt.s32.totalorder %v2092_v51, 0 }
 0x147   : > { %v496_v9 = vsel %vm486_vm10, %v493_v0, %v495_v6  ;;  %v499_v11 = vsel %vm487_vm11, %v481_v62, %v498_v7  ;;  %v411_v12 = vadd.s32 536870912, %v410_v4  ;;  %v568_v22 = vsel %vm567_vm13, %v2092_v51, 0 }
 0x148   : > { %v500_v13 = vsel %vm486_vm10, %v497_v3, %v499_v11  ;;  %v2145_v14 = vmul.u32.u64.low %v2087_v44, %v496_v9  ;;  %v2146_v17 = vmul.u32.u64.high %v2087_v44, %v496_v9, %v2145_v14  ;;  %v663_v23 = vshrl.u32 %v662_v46, 23 }
 0x149   : > { %v2150_v20 = vmul.u32.u64.low %v2087_v44, %v500_v13  ;;  %v2151_v21 = vmul.u32.u64.high %v2087_v44, %v500_v13, %v2150_v20  ;;  %v2156_v10 = vshrl.u32 %v411_v12, 30  ;;  %v492_v25 = vsel %vm486_vm10, %v489_v5, %v491_v8 }
 0x14a   : > { %v570_v28 = vand.u32 31, %v568_v22  ;;  %v2162_v29 = vand.u32 8388607, %v659_v38  ;;  %v511_v31 = vadd.s32 1, %v2146_v17  ;;  %v2168_v51 = vshll.u32 %v564_v45, 8 }
 0x14b   : > { %v413_v30 = vshll.u32 %v2156_v10, 30  ;;  %v508_v46 = vmul.u32 %v2087_v44, %v492_v25  ;;  %vm510_vm14 = vc.u32 %v2151_v21, %v2145_v14  ;;  %v569_v43 = vshrl.u32 %v568_v22, 5 }
 0x14c   : > { %v571_v32 = vsub.s32 32, %v570_v28  ;;  %v1528_v36 = vadd.s32 4294967169, %v663_v23  ;;  %v512_v40 = vsel %vm510_vm14, %v511_v31, %v2146_v17  ;;  %v573_v42 = vshll.u32 %v1870_v48, %v570_v28 }
 0x14d   : > { %v2173_v37 = vsub.s32 %v410_v4, %v413_v30  ;;  %v576_v47 = vshll.u32 %v1871_v52, %v570_v28  ;;  %v513_v39 = vadd.s32 %v512_v40, %v508_v46  ;;  %v579_v44 = vshll.u32 %v1872_v54, %v570_v28 }
 0x14e   : > { %v574_v35 = vshrl.u32 %v1871_v52, %v571_v32  ;;  %v577_v45 = vshrl.u32 %v1872_v54, %v571_v32  ;;  %v580_v53 = vshrl.u32 %v1873_v56, %v571_v32  ;;  %v582_v55 = vshll.u32 %v1873_v56, %v570_v28 }
 0x14f   : > { %v416_v49 = vsub.s32 0, %v2173_v37  ;;  %v583_v57 = vshrl.u32 %v1874_v58, %v571_v32  ;;  %v514_v59 = vadd.s32 536870912, %v513_v39  ;;  %v585_v62 = vshll.u32 %v1874_v58, %v570_v28 }
 0x150   : > { %v575_v60 = vor.u32 %v574_v35, %v573_v42  ;;  %v578_v61 = vor.u32 %v577_v45, %v576_v47  ;;  %v581_v0 = vor.u32 %v580_v53, %v579_v44  ;;  %v586_v2 = vshrl.u32 %v1875_v1, %v571_v32 }
 0x151   : > { %v1517_v63 = vmin.u32 %v416_v49, %v2173_v37  ;;  %v584_v41 = vor.u32 %v583_v57, %v582_v55  ;;  %v2188_v50 = vshrl.u32 %v514_v59, 30  ;;  %v572_v3 = vshrl.u32 %v1870_v48, %v571_v32 }
 0x152   : > { %vm588_vm15 = vcmp.lt.s32.totalorder %v569_v43, 1  ;;  %vm589_vm0 = vcmp.lt.s32.totalorder %v569_v43, 2  ;;  %v587_v5 = vor.u32 %v586_v2, %v585_v62  ;;  %vm590_vm1 = vcmp.lt.s32.totalorder %v569_v43, 3 }
 0x153   : > { %v418_v4 = vclz %v1517_v63  ;;  %vm591_vm2 = vcmp.lt.s32.totalorder %v569_v43, 4  ;;  %v516_v6 = vshll.u32 %v2188_v50, 30  ;;  %v596_v8 = vsel %vm588_vm15, %v575_v60, %v578_v61 }
 0x154   : > { %v593_v7 = vsel %vm591_vm2, %v581_v0, 2102212464  ;;  %v597_v9 = vsel %vm591_vm2, %v584_v41, 920167782  ;;  %v592_v12 = vsel %vm588_vm15, %v572_v3, %v575_v60  ;;  %v600_v17 = vsel %vm588_vm15, %v578_v61, %v581_v0 }
 0x155   : > { %v1518_v11 = vadd.s32 4294967294, %v418_v4  ;;  %v598_v13 = vsel %vm590_vm1, %v581_v0, %v597_v9  ;;  %v2192_v20 = vsub.s32 %v513_v39, %v516_v6  ;;  %v594_v22 = vsel %vm590_vm1, %v578_v61, %v593_v7 }
 0x156   : > { %v599_v23 = vsel %vm589_vm0, %v596_v8, %v598_v13  ;;  %v601_v25 = vsel %vm591_vm2, %v587_v5, 1326507024  ;;  %v406_v32 = vadd.s32 %v2119_v34, %v2116_v33  ;;  %v595_v35 = vsel %vm589_vm0, %v592_v12, %v594_v22 }
 0x157   : > { %vm1519_vm3 = vcmp.lt.s32.totalorder %v1518_v11, 0  ;;  %v602_v28 = vsel %vm590_vm1, %v584_v41, %v601_v25  ;;  %v2196_v30 = vmul.u32.u64.low %v2168_v51, %v599_v23  ;;  %v2197_v31 = vmul.u32.u64.high %v2168_v51, %v599_v23, %v2196_v30 }
 0x158   : > { %v421_v46 = vsel %vm1519_vm3, 0, %v1518_v11  ;;  %v519_v40 = vsub.s32 0, %v2192_v20  ;;  %v603_v42 = vsel %vm589_vm0, %v600_v17, %v602_v28  ;;  %v669_v45 = vadd.s32 1, %v1528_v36 }
 0x159   : > { %v422_v47 = vsub.s32 32, %v421_v46  ;;  %v426_v39 = vsub.s32 4294967266, %v421_v46  ;;  %v423_v44 = vshll.u32 %v2173_v37, %v421_v46  ;;  %v614_v34 = vadd.s32 1, %v2197_v31 }
 0x15a   : > { %v1521_v49 = vmin.u32 %v519_v40, %v2192_v20  ;;  %v2208_v53 = vmul.u32.u64.low %v2168_v51, %v603_v42  ;;  %v2209_v55 = vmul.u32.u64.high %v2168_v51, %v603_v42, %v2208_v53  ;;  %vm670_vm4 = vcmp.gt.s32.totalorder %v669_v45, 0 }
 0x15b   : > { %v424_v57 = vshrl.u32 %v406_v32, %v422_v47  ;;  %v427_v33 = vadd.s32 127, %v426_v39  ;;  %v436_v59 = vsub.s32 4, %v2156_v10  ;;  %v671_v61 = vsel %vm670_vm4, %v669_v45, 0 }
 0x15c   : > { %v521_v60 = vclz %v1521_v49  ;;  %v673_v36 = vand.u32 31, %v671_v61  ;;  %vm352_vm5 = vcmp.lt.s32.totalorder %v2059_v15, 0  ;;  %v611_v63 = vmul.u32 %v2168_v51, %v595_v35 }
 0x15d   : > { %v425_v43 = vor.u32 %v424_v57, %v423_v44  ;;  %v428_v62 = vshll.u32 %v427_v33, 23  ;;  %vm613_vm6 = vc.u32 %v2209_v55, %v2196_v30  ;;  %vm2219_vm7 = vcmp.le.f32.partialorder %v350_v16, 0.7853982 }
 0x15e   : > { %v1522_v37 = vadd.s32 4294967294, %v521_v60  ;;  %v615_v2 = vsel %vm613_vm6, %v614_v34, %v2197_v31  ;;  %v667_v3 = vor.u32 8388608, %v2162_v29  ;;  %v674_v4 = vsub.s32 32, %v673_v36 }
 0x15f   : > { %v429_v41 = vor.u32 4788187, %v428_v62  ;;  %v2228_v5 = vsel %vm352_vm5, %v436_v59, %v2156_v10  ;;  %v509_v51 = vadd.s32 %v2145_v14, %v2151_v21  ;;  %v616_v6 = vadd.s32 %v615_v2, %v611_v63 }
 0x160   : > { %vm1523_vm8 = vcmp.lt.s32.totalorder %v1522_v37, 0  ;;  %v432_v7 = vcvt.s32.f32 %v425_v43  ;;  %v539_v9 = vsub.s32 4, %v2188_v50  ;;  %v2233_v17 = vshrl.u32 %v671_v61, 5 }
 0x161   : > { %v430_v16 = vand.u32 2147483647, %v429_v41  ;;  %v524_v8 = vsel %vm1523_vm8, 0, %v1522_v37  ;;  %v617_v13 = vadd.s32 536870912, %v616_v6  ;;  %v676_v10 = vshll.u32 %v1870_v48, %v673_v36 }
 0x162   : > { %v525_v11 = vsub.s32 32, %v524_v8  ;;  %v529_v12 = vsub.s32 4294967266, %v524_v8  ;;  %v526_v23 = vshll.u32 %v2192_v20, %v524_v8  ;;  %v677_v25 = vshrl.u32 %v1871_v52, %v674_v4 }
 0x163   : > { %v433_v22 = vmul.f32 %v432_v7, %v430_v16  ;;  %v2238_v28 = vshrl.u32 %v617_v13, 30  ;;  %v680_v31 = vshrl.u32 %v1872_v54, %v674_v4  ;;  %v679_v46 = vshll.u32 %v1871_v52, %v673_v36 }
 0x164   : > { %v527_v14 = vshrl.u32 %v509_v51, %v525_v11  ;;  %v530_v21 = vadd.s32 127, %v529_v12  ;;  %v683_v40 = vshrl.u32 %v1873_v56, %v674_v4  ;;  %v686_v42 = vshrl.u32 %v1874_v58, %v674_v4 }
 0x165   : > { %v434_v32 = vxor.u32 2147483648, %v433_v22  ;;  %vm455_vm9 = vcmp.lt.s32.totalorder %v2064_v18, 0  ;;  %v619_v39 = vshll.u32 %v2238_v28, 30  ;;  %v675_v35 = vshrl.u32 %v1870_v48, %v674_v4 }
 0x166   : > { %v528_v20 = vor.u32 %v527_v14, %v526_v23  ;;  %v531_v47 = vshll.u32 %v530_v21, 23  ;;  %v678_v44 = vor.u32 %v677_v25, %v676_v10  ;;  %v682_v49 = vshll.u32 %v1872_v54, %v673_v36 }
 0x167   : > { %v435_v45 = vsel %vm352_vm5, %v434_v32, %v433_v22  ;;  %v685_v52 = vshll.u32 %v1873_v56, %v673_v36  ;;  %vm2256_vm10 = vcmp.le.f32.partialorder %v453_v19, 0.7853982  ;;  %v2260_v48 = vsub.s32 %v616_v6, %v619_v39 }
 0x168   : > { %v438_v53 = vsel %vm2219_vm7, %v2059_v15, %v435_v45  ;;  %v532_v33 = vor.u32 4788187, %v531_v47  ;;  %v681_v34 = vor.u32 %v680_v31, %v679_v46  ;;  %v684_v59 = vor.u32 %v683_v40, %v682_v49 }
 0x169   : > { %v687_v60 = vor.u32 %v686_v42, %v685_v52  ;;  %v688_v54 = vshll.u32 %v1874_v58, %v673_v36  ;;  %v689_v56 = vshrl.u32 %v1875_v1, %v674_v4  ;;  %1720 = vcosq.f32 %v438_v53 }
 0x16a   : > { %v533_v61 = vand.u32 2147483647, %v532_v33  ;;  %v535_v43 = vcvt.s32.f32 %v528_v20  ;;  %v622_v62 = vsub.s32 0, %v2260_v48  ;;  %1722 = vsinq.f32 %v438_v53 }
 0x16b   : > { %v690_v19 = vor.u32 %v689_v56, %v688_v54  ;;  %vm691_vm11 = vcmp.lt.s32.totalorder %v2233_v17, 1  ;;  %vm692_vm12 = vcmp.lt.s32.totalorder %v2233_v17, 2  ;;  %vm694_vm13 = vcmp.lt.s32.totalorder %v2233_v17, 4 }
 0x16c   : > { %v536_v37 = vmul.f32 %v535_v43, %v533_v61  ;;  %v1525_v63 = vmin.u32 %v622_v62, %v2260_v48  ;;  %v699_v58 = vsel %vm691_vm11, %v678_v44, %v681_v34  ;;  %vm693_vm14 = vcmp.lt.s32.totalorder %v2233_v17, 3 }
 0x16d   : > { %v700_v1 = vsel %vm694_vm13, %v687_v60, 920167782  ;;  %v703_v36 = vsel %vm691_vm11, %v681_v34, %v684_v59  ;;  %v704_v41 = vsel %vm694_vm13, %v690_v19, 1326507024  ;;  %v696_v51 = vsel %vm694_vm13, %v684_v59, 2102212464 }
 0x16e   : > { %v537_v2 = vxor.u32 2147483648, %v536_v37  ;;  %v624_v4 = vclz %v1525_v63  ;;  %v701_v6 = vsel %vm693_vm14, %v684_v59, %v700_v1  ;;  %v705_v7 = vsel %vm693_vm14, %v687_v60, %v704_v41 }
 0x16f   : > { %v702_v16 = vsel %vm692_vm12, %v699_v58, %v701_v6  ;;  %v707_v8 = vshll.u32 %v667_v3, 8  ;;  %v540_v11 = vsel %vm455_vm9, %v539_v9, %v2188_v50  ;;  %v695_v22 = vsel %vm691_vm11, %v675_v35, %v678_v44 }
 0x170   : > { %v538_v12 = vsel %vm455_vm9, %v537_v2, %v536_v37  ;;  %v1526_v13 = vadd.s32 4294967294, %v624_v4  ;;  %v706_v23 = vsel %vm692_vm12, %v703_v36, %v705_v7  ;;  %v697_v29 = vsel %vm693_vm14, %v681_v34, %v696_v51 }
 0x171   : > { %v541_v10 = vsel %vm2256_vm10, %v2064_v18, %v538_v12  ;;  %v2296_v3 = vmul.u32.u64.low %v707_v8, %v706_v23  ;;  %v2297_v25 = vmul.u32.u64.high %v707_v8, %v706_v23, %v2296_v3  ;;  %v542_v21 = vsel %vm2256_vm10, 0, %v540_v11 }
 0x172   : > { %1724 = vcosq.f32 %v541_v10  ;;  %vm1527_vm15 = vcmp.lt.s32.totalorder %v1526_v13, 0  ;;  %v2299_v50 = vmul.u32.u64.low %v707_v8, %v702_v16  ;;  %v2300_v9 = vmul.u32.u64.high %v707_v8, %v702_v16, %v2299_v50 }
 0x173   : > { %1726 = vsinq.f32 %v541_v10  ;;  %v627_v14 = vsel %vm1527_vm15, 0, %v1526_v13  ;;  %v2305_v31 = vpop.eup %1720  ;;  %v698_v46 = vsel %vm692_vm12, %v695_v22, %v697_v29  ;;  %v439_v40 = vsel %vm2219_vm7, 0, %v2228_v5 }
 0x174   : > { %v632_v32 = vsub.s32 4294967266, %v627_v14  ;;  %v2312_v42 = vpop.eup %1722  ;;  %vm716_vm0 = vc.u32 %v2297_v25, %v2299_v50  ;;  %v717_v20 = vadd.s32 1, %v2300_v9  ;;  %v546_v47 = vand.u32 3, %v542_v21 }
 0x175   : > { %v983_v39 = vadd.s32 3, %v542_v21  ;;  %v714_v35 = vmul.u32 %v707_v8, %v698_v46  ;;  %v443_v45 = vand.u32 3, %v439_v40  ;;  %v628_v44 = vsub.s32 32, %v627_v14 }
 0x176   : > { %v633_v49 = vadd.s32 127, %v632_v32  ;;  %v718_v17 = vsel %vm716_vm0, %v717_v20, %v2300_v9  ;;  %vm1226_vm1 = vcmask 523264   ;;  %v446_v52 = vxor.u32 2147483648, %v2312_v42 }
 0x177   : > { %v612_v0 = vadd.s32 %v2196_v30, %v2209_v55  ;;  %v719_v5 = vadd.s32 %v718_v17, %v714_v35  ;;  %vm545_vm2 = vweird.f32 %v2064_v18  ;;  %v449_v53 = vxor.u32 2147483648, %v2305_v31 }
 0x178   : > { %vm547_vm3 = vcmp.lt.s32.totalorder %v546_v47, 2  ;;  %vm548_vm4 = vcmp.eq.s32.totalorder %v546_v47, 0  ;;  %v984_v57 = vand.u32 3, %v983_v39  ;;  %vm442_vm5 = vweird.f32 %v2059_v15 }
 0x179   : > { %v879_v33 = vadd.s32 3, %v439_v40  ;;  %v629_v34 = vshll.u32 %v2260_v48, %v627_v14  ;;  %v720_v59 = vadd.s32 536870912, %v719_v5  ;;  %vm551_vm6 = vcmp.eq.s32.totalorder %v546_v47, 2 }
 0x17a   : > { %vm445_vm7 = vcmp.eq.s32.totalorder %v443_v45, 0  ;;  %v630_v54 = vshrl.u32 %v612_v0, %v628_v44  ;;  %v634_v56 = vshll.u32 %v633_v49, 23  ;;  %vm448_vm8 = vcmp.eq.s32.totalorder %v443_v45, 2 }
 0x17b   : > { %v447_v30 = vsel %vm445_vm7, %v2305_v31, %v446_v52  ;;  %v2326_v61 = vshrl.u32 %v720_v59, 30  ;;  %v450_v62 = vsel %vm448_vm8, %v449_v53, %v2312_v42  ;;  %v880_v19 = vand.u32 3, %v879_v33 }
 0x17c   : > { %v1725_v60 = vpop.eup %1724  ;;  %vm985_vm9 = vcmp.lt.s32.totalorder %v984_v57, 2  ;;  %vm986_vm10 = vcmp.eq.s32.totalorder %v984_v57, 0  ;;  %vm989_vm11 = vcmp.eq.s32.totalorder %v984_v57, 2  ;;  %vm444_vm12 = vcmp.lt.s32.totalorder %v443_v45, 2 }
 0x17d   : > { %v1727_v55 = vpop.eup %1726  ;;  %v552_v43 = vxor.u32 2147483648, %v1725_v60  ;;  %v722_v48 = vshll.u32 %v2326_v61, 30  ;;  %v635_v1 = vor.u32 4788187, %v634_v56  ;;  %v451_v2 = vsel %vm444_vm12, %v447_v30, %v450_v62 }
 0x17e   : > { %v549_v37 = vxor.u32 2147483648, %v1727_v55  ;;  %vm882_vm13 = vcmp.eq.s32.totalorder %v880_v19, 0  ;;  %v631_v16 = vor.u32 %v630_v54, %v629_v34  ;;  %v452_v13 = vsel %vm442_vm5, nan, %v451_v2 }
 0x17f   : > { %v553_v63 = vsel %vm551_vm6, %v552_v43, %v1727_v55  ;;  %v991_v58 = vsel %vm989_vm11, %v552_v43, %v1727_v55  ;;  %v723_v4 = vsub.s32 %v719_v5, %v722_v48  ;;  %v884_v11 = vsel %vm882_vm13, %v2305_v31, %v446_v52 }
 0x180   : > { %v550_v36 = vsel %vm548_vm4, %v1725_v60, %v549_v37  ;;  %v988_v41 = vsel %vm986_vm10, %v1725_v60, %v549_v37  ;;  %vm885_vm14 = vcmp.eq.s32.totalorder %v880_v19, 2  ;;  %v636_v22 = vand.u32 2147483647, %v635_v1 }
 0x181   : > { %v554_v51 = vsel %vm547_vm3, %v550_v36, %v553_v63  ;;  %v992_v6 = vsel %vm985_vm9, %v988_v41, %v991_v58  ;;  %v725_v12 = vsub.s32 0, %v723_v4  ;;  %vm881_vm15 = vcmp.lt.s32.totalorder %v880_v19, 2 }
 0x182   : > { %v555_v7 = vsel %vm545_vm2, nan, %v554_v51  ;;  %v993_v8 = vsel %vm545_vm2, nan, %v992_v6  ;;  %v887_v23 = vsel %vm885_vm14, %v449_v53, %v2312_v42  ;;  %v638_v18 = vcvt.s32.f32 %v631_v16 }
 0x183   : > { %1548 = vmatprep.mubr.msk.f32.mxu1 %vm1226_vm1, %v993_v8  ;;  %1550 = vmatprep.mubr.msk.f32.mxu0 %vm1226_vm1, %v555_v7  ;;  %v1529_v10 = vmin.u32 %v725_v12, %v723_v4  ;;  %v888_v29 = vsel %vm881_vm15, %v884_v11, %v887_v23  ;;  %v715_v46 = vadd.s32 %v2299_v50, %v2297_v25  ;;  %vm558_vm2 = vcmp.lt.s32.totalorder %v2072_v24, 0 }
 0x184   : > { %1379 = vmatmul.mubr.f32.vlgmr.msra.gmra.mrb[4].mxu0 %v452_v13  ;;  %v889_v3 = vsel %vm442_vm5, nan, %v888_v29  ;;  %v639_v14 = vmul.f32 %v638_v18, %v636_v22  ;;  %vm2352_vm3 = vcmp.le.f32.partialorder %v556_v26, 0.7853982  ;;  %v642_v49 = vsub.s32 4, %v2238_v28 }
 0x185   : > { %v727_v9 = vclz %v1529_v10  ;;  %1298 = vmatmul.mubr.f32.vlgmr.msra.gmra.mrb[0].mxu1 %v889_v3  ;;  %v745_v5 = vsub.s32 4, %v2326_v61  ;;  %vm661_vm4 = vcmp.lt.s32.totalorder %v2075_v27, 0  ;;  %vm660_vm5 = vcmp.le.f32.partialorder %v659_v38, 0.7853982  ;;  %v1552_v3 = vld [vmem:[%s2435_s4] ss:$0 sm:$0xff] }
 0x186   : > { %v640_v31 = vxor.u32 2147483648, %v639_v14  ;;  %v643_v26 = vsel %vm558_vm2, %v642_v49, %v2238_v28 }
 0x187   : > { %v1530_v21 = vadd.s32 4294967294, %v727_v9  ;;  %v746_v33 = vsel %vm661_vm4, %v745_v5, %v2326_v61  ;;  %v645_v34 = vsel %vm2352_vm3, 0, %v643_v26 }
 0x188   : > { %v641_v15 = vsel %vm558_vm2, %v640_v31, %v639_v14  ;;  %v748_v60 = vsel %vm660_vm5, 0, %v746_v33  ;;  %v1087_v54 = vadd.s32 3, %v645_v34  ;;  %v649_v19 = vand.u32 3, %v645_v34 }
 0x189   : > { %vm1531_vm0 = vcmp.lt.s32.totalorder %v1530_v21, 0  ;;  %v644_v25 = vsel %vm2352_vm3, %v2072_v24, %v641_v15  ;;  %v1191_v30 = vadd.s32 3, %v748_v60  ;;  %v752_v55 = vand.u32 3, %v748_v60 }
 0x18a   : > { %v730_v32 = vsel %vm1531_vm0, 0, %v1530_v21  ;;  %1728 = vcosq.f32 %v644_v25  ;;  %v1088_v43 = vand.u32 3, %v1087_v54  ;;  %vm651_vm11 = vcmp.eq.s32.totalorder %v649_v19, 0 }
 0x18b   : > { %v731_v40 = vsub.s32 32, %v730_v32  ;;  %v735_v20 = vsub.s32 4294967266, %v730_v32  ;;  %v732_v42 = vshll.u32 %v723_v4, %v730_v32  ;;  %1730 = vsinq.f32 %v644_v25 }
 0x18c   : > { %v1192_v37 = vand.u32 3, %v1191_v30  ;;  %vm753_vm6 = vcmp.lt.s32.totalorder %v752_v55, 2  ;;  %vm754_vm7 = vcmp.eq.s32.totalorder %v752_v55, 0  ;;  %vm1089_vm8 = vcmp.lt.s32.totalorder %v1088_v43, 2 }
 0x18d   : > { %v733_v47 = vshrl.u32 %v715_v46, %v731_v40  ;;  %v736_v39 = vadd.s32 127, %v735_v20  ;;  %vm1093_vm9 = vcmp.eq.s32.totalorder %v1088_v43, 2  ;;  %vm1090_vm10 = vcmp.eq.s32.totalorder %v1088_v43, 0 }
 0x18e   : > { %vm654_vm12 = vcmp.eq.s32.totalorder %v649_v19, 2  ;;  %vm1193_vm13 = vcmp.lt.s32.totalorder %v1192_v37, 2  ;;  %vm1197_vm14 = vcmp.eq.s32.totalorder %v1192_v37, 2  ;;  %vm757_vm15 = vcmp.eq.s32.totalorder %v752_v55, 2 }
 0x18f   : > { %v734_v35 = vor.u32 %v733_v47, %v732_v42  ;;  %v737_v45 = vshll.u32 %v736_v39, 23  ;;  %vm1194_vm0 = vcmp.eq.s32.totalorder %v1192_v37, 0  ;;  %vm650_vm2 = vcmp.lt.s32.totalorder %v649_v19, 2 }
 0x190   : > { %vm751_vm3 = vweird.f32 %v2075_v27 }
 0x191   : > { %v738_v50 = vor.u32 4788187, %v737_v45  ;;  %v741_v52 = vcvt.s32.f32 %v734_v35 }
 0x193   : > { %v739_v17 = vand.u32 2147483647, %v738_v50 }
 0x194   : > { %v1729_v56 = vpop.eup %1728 }
 0x195   : > { %v742_v0 = vmul.f32 %v741_v52, %v739_v17  ;;  %v1731_v28 = vpop.eup %1730  ;;  %v655_v62 = vxor.u32 2147483648, %v1729_v56 }
 0x196   : > { %v652_v38 = vxor.u32 2147483648, %v1731_v28 }
 0x197   : > { %v743_v53 = vxor.u32 2147483648, %v742_v0  ;;  %v1095_v48 = vsel %vm1093_vm9, %v655_v62, %v1731_v28  ;;  %v656_v41 = vsel %vm654_vm12, %v655_v62, %v1731_v28 }
 0x198   : > { %v1092_v1 = vsel %vm1090_vm10, %v1729_v56, %v652_v38  ;;  %v653_v36 = vsel %vm651_vm11, %v1729_v56, %v652_v38 }
 0x199   : > { %v744_v57 = vsel %vm661_vm4, %v743_v53, %v742_v0  ;;  %v1096_v7 = vsel %vm1089_vm8, %v1092_v1, %v1095_v48  ;;  %v657_v8 = vsel %vm650_vm2, %v653_v36, %v656_v41  ;;  %vm648_vm4 = vweird.f32 %v2072_v24 }
 0x19a   : > { %v747_v59 = vsel %vm660_vm5, %v2075_v27, %v744_v57  ;;  %v1097_v23 = vsel %vm648_vm4, nan, %v1096_v7  ;;  %v658_v10 = vsel %vm648_vm4, nan, %v657_v8  ;;  %vm1400_vm5 = vcmask 785408  }
 0x19b   : > { %1732 = vcosq.f32 %v747_v59 }
 0x19c   : > { %1734 = vsinq.f32 %v747_v59 }
 0x1a5   : > { %v1733_v61 = vpop.eup %1732 }
 0x1a6   : > { %v1735_v63 = vpop.eup %1734  ;;  %v758_v58 = vxor.u32 2147483648, %v1733_v61 }
 0x1a7   : > { %v755_v2 = vxor.u32 2147483648, %v1735_v63 }
 0x1a8   : > { %v1199_v4 = vsel %vm1197_vm14, %v758_v58, %v1735_v63  ;;  %v759_v51 = vsel %vm757_vm15, %v758_v58, %v1735_v63 }
 0x1a9   : > { %v1196_v6 = vsel %vm1194_vm0, %v1733_v61, %v755_v2  ;;  %v756_v16 = vsel %vm754_vm7, %v1733_v61, %v755_v2 }
 0x1aa   : > { %v1200_v11 = vsel %vm1193_vm13, %v1196_v6, %v1199_v4  ;;  %v760_v12 = vsel %vm753_vm6, %v756_v16, %v759_v51 }
 0x1ab   : > { %v1201_v13 = vsel %vm751_vm3, nan, %v1200_v11  ;;  %v761_v22 = vsel %vm751_vm3, nan, %v760_v12 }
 0x1ac   : > { %1549 = vmatprep.mubr.msk.f32.mxu1 %vm1226_vm1, %v1201_v13  ;;  %1551 = vmatprep.mubr.msk.f32.mxu0 %vm1226_vm1, %v761_v22 }
 0x1ad   : > { %1303 = vmatmul.mubr.f32.gmra.mrb[2].mxu1 %v1097_v23  ;;  %1384 = vmatmul.mubr.f32.gmra.mrb[6].mxu0 %v658_v10 }
 0x257   : > { %v1380_v29 = vpop.f32.mrb[4].mxu0 }
 0x258   : > { %v1382_v18 = vpop.f32.mrb[5].mxu0  ;;  %v1299_v27 = vpop.f32.mrb[0].mxu1 }
 0x259   : > { %v1381_v9 = vadd.f32 %v1380_v29, %v1299_v27  ;;  %v1301_v24 = vpop.f32.mrb[1].mxu1 }
 0x25b   : > { %v1396_v14 = vadd.f32 %v1552_v3, %v1381_v9 }
 0x25d   : > { %v1398_v21 = vmax.f32 %v1396_v14, 0.0 }
 0x25f   : > { %1401 = vst.msk [vmem:[%s248_s16] sm:$0xff] %vm1400_vm5, %v1398_v21 }
 0x280   : > { %v1304_v31 = vpop.f32.mrb[2].mxu1  ;;  %v1385_v32 = vpop.f32.mrb[6].mxu0 }
 0x281   : > { %v1386_v46 = vadd.f32 %v1385_v32, %v1304_v31  ;;  %v1306_v40 = vpop.f32.mrb[3].mxu1  ;;  %v1387_v20 = vpop.f32.mrb[7].mxu0 }
 0x283   : > { %v1397_v42 = vadd.f32 %v1552_v3, %v1386_v46 }
 0x285   : > { %v1399_v47 = vmax.f32 %v1397_v42, 0.0 }
 0x287   : > { %1402 = vst.msk [vmem:[%s248_s16 + $0x8] sm:$0xff] %vm1400_vm5, %v1399_v47 }
 0x288   : > { %1805 = shalt.err (!%p1802_p11)
}
 0x289   : > { %s1806_s9 = scalar_lea.hbm %s2386_s8, 256  ;;  %s1810_s13 = scalar_lea.hbm %s2436_s5, 512 }
 0x28a   : > { %p1807_p13 = scmp.ne.s32.totalorder %s2386_s8, %s1806_s9  ;;  %p1811_p6 = scmp.lt.u32.totalorder %s2386_s8, %s2436_s5 }
 0x28b   : > { %p1812_p9 = scmp.lt.u32.totalorder %s1810_s13, %s1806_s9  ;;  %p1814_p10 = scmp.lt.u32.totalorder %s1806_s9, %s2386_s8 }
 0x28c   : > { %p1808_p5 = pnand %p1807_p13, %p2455_p1 }
 0x28d   : > { %p1813_p12 = por %p1812_p9, %p1811_p6 }
 0x28e   : > { %p1809_p0 = pneg %p1808_p5 }
 0x28f   : > { %p1815_p2 = por %p1814_p10, %p1813_p12 }
 0x291   : > { %p1816_p3 = pnand %p1815_p2, %p1809_p0 }
 0x293   : > { %1819 = shalt.err (!%p1816_p3)
}
 0x294   : > { %s1877_s16 = smov 128   ;;  %s1878_s17 = smov 8  }
 0x295   : > { %1655 = dma.vmem_to_hbm [thread:$0]  (%p2455_p1), %s2388_s7, 256, %s2386_s8, %s2390_s30, %s1877_s16, %s1877_s16, %s1878_s17  }
 0x296 PF: > { %p1672_p4 = scmp.ge.s32.totalorder %s1862_s21, 2  ;;  %s1432_s23 = sand.u32 1, %s1850_s18  }
 0x297   : > { %p2456_p7 = scmp.ne.s32.totalorder %s2441_s29, 0  ;;  %s1433_s6 = scalar_lea.sflag [#allocation4], %s1432_s23 }
 0x299   : > { %p1665_p8 = pnand %p1672_p4, %p2456_p7 }
 0x29b   : > { %1845 = dma.done.wait (!%p1665_p8), %s1433_s6, 256  }
 0x29c   : > { %1847 = vsyncadd (!%p1665_p8), %s1433_s6, 4294967040  ;;  %p17_p11 = scmp.ge.s32.totalorder %s1934_s24, 4   ;;  %s2457_s18 = smov %s1854_s19 }
 0x29d   : > { %s2458_s19 = smov %s1858_s20  ;;  %s2459_s20 = smov %s1945_s27 }
 0x29e   : > { %s2460_s21 = smov %s1934_s24  ;;  %19 = sbr.rel (!%p17_p11) target bundleno = 5 (0x5), region = 84 }
 0x2a5   :  { %1438 = vsyncpa [#allocation3], 1 }
 0x2a6   :  { %1440 = vsyncpa [#allocation3 + $0x1], 1 }
 0x2a7   :  { %1441 = vsyncpa [#allocation6], 1 }
 0x2a8   :  { %1442 = vsyncpa [#allocation4], 1 }
 0x2a9   :  { %1444 = vsyncpa [#allocation4 + $0x1], 1 }

</bundles_post_ra>
